<compile_context>
chip_gen: v5e
topology: v5e:2x2
jax: 0.10.0
libtpu: 0.0.40
codegen_flags: <defaults>
</compile_context>

<pallas_src>
import functools

import jax
import jax.numpy as jnp
from jax.experimental import pallas as pl
from jax.experimental.pallas import tpu as pltpu

_LANE = 128


def _dice_bce_kernel(x_ref, t_ref, out_ref, *, steps_per_chunk, n_rows,
                     need_mask):
    c = pl.program_id(0)          # chunk axis ("parallel")
    s = pl.program_id(1)          # step axis inside a chunk ("arbitrary")
    rows = x_ref.shape[0]         # static; multiple of the sublane pack
    g = rows // 8

    @pl.when(s == 0)
    def _init():
        out_ref[...] = jnp.zeros_like(out_ref)

    # Cast-under-DMA: inputs stay in their native dtype in HBM.
    x = x_ref[...].astype(jnp.float32)
    t = t_ref[...].astype(jnp.float32)

    def accumulate(xv, tv):
        # PyTorch F.binary_cross_entropy clamps each log at -100.  We
        # accumulate the POSITIVE sum  log(1-x) + t*(log x - log(1-x))  and
        # negate once in the wrapper (one fewer VALU op per vreg).
        log_x = jnp.maximum(jnp.log(xv), -100.0)
        log_1mx = jnp.maximum(jnp.log(1.0 - xv), -100.0)
        bce_pos = log_1mx + tv * (log_x - log_1mx)

        def fold(v):
            # VPU-only partial reduce: (rows,128) -> (rows/8,8,128) -> (8,128).
            # No per-step XLU cross-lane reduction.
            return jnp.sum(v.reshape(g, 8, _LANE), axis=0)

        out_ref[0, 0] += fold(xv * tv)   # intersection partials
        out_ref[0, 1] += fold(xv)        # sum(x) partials
        out_ref[0, 2] += fold(tv)        # sum(t) partials
        out_ref[0, 3] += fold(bce_pos)   # +BCE-sum partials

    if need_mask:
        # Only the final (possibly partial) block and any clamped duplicate
        # block need the row mask; gate it so the steady state pays nothing.
        blk = c * steps_per_chunk + s
        is_boundary = (blk * rows + rows) > n_rows

        @pl.when(jnp.logical_not(is_boundary))
        def _full_block():
            accumulate(x, t)

        @pl.when(is_boundary)
        def _masked_block():
            row_ids = blk * rows + jax.lax.broadcasted_iota(
                jnp.int32, (rows, 1), 0)
            valid = row_ids < n_rows
            # (x=0, t=0) rows contribute exactly 0 to every accumulated term
            # (including BCE, thanks to the -100 log clamp).
            accumulate(jnp.where(valid, x, 0.0), jnp.where(valid, t, 0.0))
    else:
        accumulate(x, t)


def _partial_sums_jax(x, t):
    """f32 (intersection, sum_x, sum_t, +bce_sum) for a small flat slice."""
    x = x.astype(jnp.float32)
    t = t.astype(jnp.float32)
    log_x = jnp.maximum(jnp.log(x), -100.0)
    log_1mx = jnp.maximum(jnp.log(1.0 - x), -100.0)
    bce_pos = log_1mx + t * (log_x - log_1mx)
    return jnp.sum(x * t), jnp.sum(x), jnp.sum(t), jnp.sum(bce_pos)


def dice_bce_loss(inputs, targets, smooth=1.0, block_rows=4096):
    """Pallas TPU DiceBCELoss.  Inputs are post-sigmoid probabilities.

    bf16 inputs/targets (produced upstream) halve HBM traffic and are the
    recommended configuration on v5e/v6e; math is f32 inside the kernel.
    """
    x = inputs.reshape(-1)
    t = targets.reshape(-1)
    n = x.shape[0]

    # Sublane packing multiple for the narrower input dtype
    # (8 for 4-byte, 16 for 2-byte, 32 for 1-byte dtypes).
    itemsize = int(min(x.dtype.itemsize, t.dtype.itemsize))
    pack = max(8, 32 // itemsize)

    n_main = (n // _LANE) * _LANE
    n_rows = n_main // _LANE

    if n_rows < pack:
        # Tiny input: the kernel brings nothing; plain JAX, identical math.
        inter, sx, st, bce_pos = _partial_sums_jax(x, t)
    else:
        if n_main != n:
            # Ragged: kernel streams the 128-aligned prefix; the (<128-elem)
            # tail is folded into the scalar combine below in plain JAX.
            # TODO(synk): the prefix slice may still cost one HBM copy in XLA;
            # the aligned path (the common case) is fully zero-copy.
            x_main, t_main = x[:n_main], t[:n_main]
        else:
            x_main, t_main = x, t
        x2 = x_main.reshape(n_rows, _LANE)   # metadata-only reshape
        t2 = t_main.reshape(n_rows, _LANE)

        # Tile height: multiple of `pack`, as large as possible up to block_rows.
        block_rows_eff = max(pack, min((int(block_rows) // pack) * pack,
                                       (n_rows // pack) * pack))
        nb = int(pl.cdiv(n_rows, block_rows_eff))

        # Leading "parallel" chunk axis: >=2 lets 2-TC parts (v7x) stream HBM
        # on both cores; prefer a divisor of nb so no clamped duplicates occur.
        n_chunks = 1
        for d in (4, 3, 2):
            if nb % d == 0:
                n_chunks = d
                break
        if n_chunks == 1 and nb >= 4:
            n_chunks = 2            # accepts one clamped (fully-masked) block
        steps = int(pl.cdiv(nb, n_chunks))
        total_blocks = n_chunks * steps
        need_mask = (total_blocks * block_rows_eff) > n_rows

        if total_blocks > nb:
            def in_map(c, s):
                return (jnp.minimum(c * steps + s, nb - 1), 0)
        else:
            def in_map(c, s):
                return (c * steps + s, 0)

        kernel = functools.partial(
            _dice_bce_kernel,
            steps_per_chunk=steps,
            n_rows=int(n_rows),
            need_mask=bool(need_mask),
        )

        grid_spec = pltpu.PrefetchScalarGridSpec(
            num_scalar_prefetch=0,
            grid=(n_chunks, steps),
            in_specs=[
                pl.BlockSpec((block_rows_eff, _LANE), in_map),
                pl.BlockSpec((block_rows_eff, _LANE), in_map),
            ],
            out_specs=pl.BlockSpec((1, 4, 8, _LANE), lambda c, s: (c, 0, 0, 0)),
        )

        in_bytes = x2.size * x2.dtype.itemsize + t2.size * t2.dtype.itemsize
        out_bytes = n_chunks * 4 * 8 * _LANE * 4
        cost = pl.CostEstimate(
            flops=14 * int(x2.size),
            transcendentals=2 * int(x2.size),
            bytes_accessed=int(in_bytes + out_bytes),
        )

        # Double-buffered working set; only override the scoped-VMEM default
        # when a caller pushes block_rows far past the default.  Ceiling is
        # derived from the part's actual VMEM capacity (v7x-safe: 64 MiB).
        working_set = (2 * block_rows_eff * _LANE
                       * (x2.dtype.itemsize + t2.dtype.itemsize)
                       + 2 * n_chunks * 4 * 8 * _LANE * 4)
        cp_kwargs = dict(dimension_semantics=("parallel", "arbitrary"))
        if working_set > 12 * 1024 * 1024:
            try:
                vmem_cap = int(pltpu.get_tpu_info().vmem_capacity_bytes)
            except Exception:
                vmem_cap = 64 << 20
            cp_kwargs["vmem_limit_bytes"] = int(
                min(working_set + (4 << 20), int(0.6 * vmem_cap)))

        partials = pl.pallas_call(
            kernel,
            out_shape=jax.ShapeDtypeStruct((n_chunks, 4, 8, _LANE),
                                           jnp.float32),
            grid_spec=grid_spec,
            compiler_params=pltpu.CompilerParams(**cp_kwargs),
            cost_estimate=cost,
        )(x2, t2)

        # Tiny final reduction in plain JAX: (n_chunks,4,8,128) -> (4,).
        sums = jnp.sum(partials, axis=(0, 2, 3))
        inter, sx, st, bce_pos = sums[0], sums[1], sums[2], sums[3]

        if n_main != n:
            ti, tsx, tst, tb = _partial_sums_jax(x[n_main:], t[n_main:])
            inter, sx, st, bce_pos = inter + ti, sx + tsx, st + tst, bce_pos + tb

    smooth = jnp.float32(smooth)
    bce = -bce_pos / jnp.float32(n)            # single negate, mean over n
    dice_loss = 1.0 - (2.0 * inter + smooth) / (sx + st + smooth)
    return bce + dice_loss


def _reference_dice_bce(inputs, targets, smooth=1.0):
    """Pure-JAX reference matching the PyTorch module."""
    x = inputs.reshape(-1).astype(jnp.float32)
    t = targets.reshape(-1).astype(jnp.float32)
    intersection = jnp.sum(x * t)
    dice_loss = 1.0 - (2.0 * intersection + smooth) / (
        jnp.sum(x) + jnp.sum(t) + smooth)
    log_p = jnp.maximum(jnp.log(x), -100.0)
    log_1mp = jnp.maximum(jnp.log(1.0 - x), -100.0)
    bce = jnp.mean(-(t * log_p + (1.0 - t) * log_1mp))
    return bce + dice_loss


if __name__ == "__main__":
    key = jax.random.PRNGKey(0)
    k1, k2, k3, k4 = jax.random.split(key, 4)

    # NCHW prediction probabilities (post-sigmoid) and binary targets,
    # flattened inside the loss — matches the PyTorch module's view(-1).
    shape = (2, 4, 16, 16)          # n = 2048: 128-aligned, zero-copy path
    inputs = jax.random.uniform(k1, shape, dtype=jnp.float32,
                                minval=1e-4, maxval=1.0 - 1e-4)
    targets = (jax.random.uniform(k2, shape, dtype=jnp.float32) > 0.5).astype(
        jnp.float32)

    loss = dice_bce_loss(inputs, targets, smooth=1.0)
    loss = jax.block_until_ready(loss)
    ref = _reference_dice_bce(inputs, targets, smooth=1.0)
    assert jnp.allclose(loss, ref, rtol=1e-5, atol=1e-5), (loss, ref)

    # Ragged shape: exercises the gated tail mask + plain-JAX tail fold.
    shape_r = (2, 3, 17, 17)        # n = 1734: kernel prefix + 70-elem tail
    inputs_r = jax.random.uniform(k3, shape_r, dtype=jnp.float32,
                                  minval=1e-4, maxval=1.0 - 1e-4)
    targets_r = (jax.random.uniform(k4, shape_r, dtype=jnp.float32)
                 > 0.5).astype(jnp.float32)
    loss_r = jax.block_until_ready(dice_bce_loss(inputs_r, targets_r, 1.0))
    ref_r = _reference_dice_bce(inputs_r, targets_r, 1.0)
    assert jnp.allclose(loss_r, ref_r, rtol=1e-5, atol=1e-5), (loss_r, ref_r)

    print("KERNEL_OK")
</pallas_src>

<mosaic_0001>
module attributes {stable_mosaic.version = 11 : i64} {
  func.func @_dice_bce_kernel(%arg0: i32, %arg1: i32, %arg2: memref<16x128xf32, #tpu.memory_space<vmem>>, %arg3: memref<16x128xf32, #tpu.memory_space<vmem>>, %arg4: memref<1x4x8x128xf32, #tpu.memory_space<vmem>>) attributes {dimension_semantics = [#tpu.dimension_semantics<parallel>, #tpu.dimension_semantics<arbitrary>], iteration_bounds = array<i64: 1, 1>, scalar_prefetch = 0 : i64, scratch_operands = 0 : i64, tpu.core_type = #tpu.core_type<tc>, window_params = [{transform_indices = @transform_0, window_bounds = array<i64: 16, 128>}, {transform_indices = @transform_1, window_bounds = array<i64: 16, 128>}, {transform_indices = @transform_2, window_bounds = array<i64: 1, 4, 8, 128>}]} {
    %c0_i32 = arith.constant 0 : i32
    %0 = arith.cmpi eq, %arg1, %c0_i32 : i32
    %1 = arith.extui %0 : i1 to i32
    %c0_i32_0 = arith.constant 0 : i32
    %2 = arith.cmpi ne, %1, %c0_i32_0 : i32
    scf.if %2 {
      %cst_39 = arith.constant 0.000000e+00 : f32
      %49 = vector.broadcast %cst_39 : f32 to vector<1x4x8x128xf32>
      %c0_40 = arith.constant 0 : index
      %c0_41 = arith.constant 0 : index
      %c0_42 = arith.constant 0 : index
      %c0_43 = arith.constant 0 : index
      %50 = vector.load %arg4[%c0_40, %c0_41, %c0_42, %c0_43] : memref<1x4x8x128xf32, #tpu.memory_space<vmem>>, vector<1x4x8x128xf32>
      tpu.vector_store %arg4[%c0_40, %c0_41, %c0_42, %c0_43], %49 {strides = array<i32>} : memref<1x4x8x128xf32, #tpu.memory_space<vmem>>, vector<1x4x8x128xf32>,
    } else {
    }
    %c0 = arith.constant 0 : index
    %c0_1 = arith.constant 0 : index
    %3 = vector.load %arg2[%c0, %c0_1] : memref<16x128xf32, #tpu.memory_space<vmem>>, vector<16x128xf32>
    %c0_2 = arith.constant 0 : index
    %c0_3 = arith.constant 0 : index
    %4 = vector.load %arg3[%c0_2, %c0_3] : memref<16x128xf32, #tpu.memory_space<vmem>>, vector<16x128xf32>
    %5 = math.log %3 : vector<16x128xf32>
    %cst = arith.constant -1.000000e+02 : f32
    %6 = vector.broadcast %cst : f32 to vector<16x128xf32>
    %7 = arith.maximumf %5, %6 : vector<16x128xf32>
    %cst_4 = arith.constant 1.000000e+00 : f32
    %8 = vector.broadcast %cst_4 : f32 to vector<16x128xf32>
    %9 = arith.subf %8, %3 : vector<16x128xf32>
    %10 = math.log %9 : vector<16x128xf32>
    %cst_5 = arith.constant -1.000000e+02 : f32
    %11 = vector.broadcast %cst_5 : f32 to vector<16x128xf32>
    %12 = arith.maximumf %10, %11 : vector<16x128xf32>
    %13 = arith.subf %7, %12 : vector<16x128xf32>
    %14 = arith.mulf %4, %13 : vector<16x128xf32>
    %15 = arith.addf %12, %14 : vector<16x128xf32>
    %c0_6 = arith.constant 0 : index
    %c0_7 = arith.constant 0 : index
    %c0_8 = arith.constant 0 : index
    %c0_9 = arith.constant 0 : index
    %16 = vector.load %arg4[%c0_6, %c0_7, %c0_8, %c0_9] : memref<1x4x8x128xf32, #tpu.memory_space<vmem>>, vector<1x1x8x128xf32>
    %17 = vector.shape_cast %16 : vector<1x1x8x128xf32> to vector<8x128xf32>
    %18 = arith.mulf %3, %4 : vector<16x128xf32>
    %19 = vector.shape_cast %18 : vector<16x128xf32> to vector<2x8x128xf32>
    %cst_10 = arith.constant dense<0.000000e+00> : vector<8x128xf32>
    %20 = vector.multi_reduction <add>, %19, %cst_10 [0] : vector<2x8x128xf32> to vector<8x128xf32>
    %21 = arith.addf %17, %20 : vector<8x128xf32>
    %c0_11 = arith.constant 0 : index
    %c0_12 = arith.constant 0 : index
    %c0_13 = arith.constant 0 : index
    %c0_14 = arith.constant 0 : index
    %22 = vector.load %arg4[%c0_11, %c0_12, %c0_13, %c0_14] : memref<1x4x8x128xf32, #tpu.memory_space<vmem>>, vector<1x1x8x128xf32>
    %23 = vector.shape_cast %22 : vector<1x1x8x128xf32> to vector<8x128xf32>
    %24 = vector.shape_cast %21 : vector<8x128xf32> to vector<1x1x8x128xf32>
    tpu.vector_store %arg4[%c0_11, %c0_12, %c0_13, %c0_14], %24 {strides = array<i32>} : memref<1x4x8x128xf32, #tpu.memory_space<vmem>>, vector<1x1x8x128xf32>,
    %c0_15 = arith.constant 0 : index
    %c1 = arith.constant 1 : index
    %c0_16 = arith.constant 0 : index
    %c0_17 = arith.constant 0 : index
    %25 = vector.load %arg4[%c0_15, %c1, %c0_16, %c0_17] : memref<1x4x8x128xf32, #tpu.memory_space<vmem>>, vector<1x1x8x128xf32>
    %26 = vector.shape_cast %25 : vector<1x1x8x128xf32> to vector<8x128xf32>
    %27 = vector.shape_cast %3 : vector<16x128xf32> to vector<2x8x128xf32>
    %cst_18 = arith.constant dense<0.000000e+00> : vector<8x128xf32>
    %28 = vector.multi_reduction <add>, %27, %cst_18 [0] : vector<2x8x128xf32> to vector<8x128xf32>
    %29 = arith.addf %26, %28 : vector<8x128xf32>
    %c0_19 = arith.constant 0 : index
    %c1_20 = arith.constant 1 : index
    %c0_21 = arith.constant 0 : index
    %c0_22 = arith.constant 0 : index
    %30 = vector.load %arg4[%c0_19, %c1_20, %c0_21, %c0_22] : memref<1x4x8x128xf32, #tpu.memory_space<vmem>>, vector<1x1x8x128xf32>
    %31 = vector.shape_cast %30 : vector<1x1x8x128xf32> to vector<8x128xf32>
    %32 = vector.shape_cast %29 : vector<8x128xf32> to vector<1x1x8x128xf32>
    tpu.vector_store %arg4[%c0_19, %c1_20, %c0_21, %c0_22], %32 {strides = array<i32>} : memref<1x4x8x128xf32, #tpu.memory_space<vmem>>, vector<1x1x8x128xf32>,
    %c0_23 = arith.constant 0 : index
    %c2 = arith.constant 2 : index
    %c0_24 = arith.constant 0 : index
    %c0_25 = arith.constant 0 : index
    %33 = vector.load %arg4[%c0_23, %c2, %c0_24, %c0_25] : memref<1x4x8x128xf32, #tpu.memory_space<vmem>>, vector<1x1x8x128xf32>
    %34 = vector.shape_cast %33 : vector<1x1x8x128xf32> to vector<8x128xf32>
    %35 = vector.shape_cast %4 : vector<16x128xf32> to vector<2x8x128xf32>
    %cst_26 = arith.constant dense<0.000000e+00> : vector<8x128xf32>
    %36 = vector.multi_reduction <add>, %35, %cst_26 [0] : vector<2x8x128xf32> to vector<8x128xf32>
    %37 = arith.addf %34, %36 : vector<8x128xf32>
    %c0_27 = arith.constant 0 : index
    %c2_28 = arith.constant 2 : index
    %c0_29 = arith.constant 0 : index
    %c0_30 = arith.constant 0 : index
    %38 = vector.load %arg4[%c0_27, %c2_28, %c0_29, %c0_30] : memref<1x4x8x128xf32, #tpu.memory_space<vmem>>, vector<1x1x8x128xf32>
    %39 = vector.shape_cast %38 : vector<1x1x8x128xf32> to vector<8x128xf32>
    %40 = vector.shape_cast %37 : vector<8x128xf32> to vector<1x1x8x128xf32>
    tpu.vector_store %arg4[%c0_27, %c2_28, %c0_29, %c0_30], %40 {strides = array<i32>} : memref<1x4x8x128xf32, #tpu.memory_space<vmem>>, vector<1x1x8x128xf32>,
    %c0_31 = arith.constant 0 : index
    %c3 = arith.constant 3 : index
    %c0_32 = arith.constant 0 : index
    %c0_33 = arith.constant 0 : index
    %41 = vector.load %arg4[%c0_31, %c3, %c0_32, %c0_33] : memref<1x4x8x128xf32, #tpu.memory_space<vmem>>, vector<1x1x8x128xf32>
    %42 = vector.shape_cast %41 : vector<1x1x8x128xf32> to vector<8x128xf32>
    %43 = vector.shape_cast %15 : vector<16x128xf32> to vector<2x8x128xf32>
    %cst_34 = arith.constant dense<0.000000e+00> : vector<8x128xf32>
    %44 = vector.multi_reduction <add>, %43, %cst_34 [0] : vector<2x8x128xf32> to vector<8x128xf32>
    %45 = arith.addf %42, %44 : vector<8x128xf32>
    %c0_35 = arith.constant 0 : index
    %c3_36 = arith.constant 3 : index
    %c0_37 = arith.constant 0 : index
    %c0_38 = arith.constant 0 : index
    %46 = vector.load %arg4[%c0_35, %c3_36, %c0_37, %c0_38] : memref<1x4x8x128xf32, #tpu.memory_space<vmem>>, vector<1x1x8x128xf32>
    %47 = vector.shape_cast %46 : vector<1x1x8x128xf32> to vector<8x128xf32>
    %48 = vector.shape_cast %45 : vector<8x128xf32> to vector<1x1x8x128xf32>
    tpu.vector_store %arg4[%c0_35, %c3_36, %c0_37, %c0_38], %48 {strides = array<i32>} : memref<1x4x8x128xf32, #tpu.memory_space<vmem>>, vector<1x1x8x128xf32>,
    return
  }
  func.func @transform_0(%arg0: i32, %arg1: i32) -> (i32, i32) {
    %c1_i32 = arith.constant 1 : i32
    %0 = arith.muli %arg0, %c1_i32 : i32
    %1 = arith.addi %0, %arg1 : i32
    %c0_i32 = arith.constant 0 : i32
    %c0_i32_0 = arith.constant 0 : i32
    return %1, %c0_i32 : i32, i32
  }
  func.func @transform_1(%arg0: i32, %arg1: i32) -> (i32, i32) {
    %c1_i32 = arith.constant 1 : i32
    %0 = arith.muli %arg0, %c1_i32 : i32
    %1 = arith.addi %0, %arg1 : i32
    %c0_i32 = arith.constant 0 : i32
    %c0_i32_0 = arith.constant 0 : i32
    return %1, %c0_i32 : i32, i32
  }
  func.func @transform_2(%arg0: i32, %arg1: i32) -> (i32, i32, i32, i32) {
    %c0_i32 = arith.constant 0 : i32
    %c0_i32_0 = arith.constant 0 : i32
    %c0_i32_1 = arith.constant 0 : i32
    %c0_i32_2 = arith.constant 0 : i32
    return %arg0, %c0_i32, %c0_i32_0, %c0_i32_1 : i32, i32, i32, i32
  }
}

</mosaic_0001>

<bundles_post_ra>
// kernel: tpu_custom_call.1
= control target key start
LH: loop header
LB: loop body
LE: loop exit
PB: predicated region body
PF: predicated region fallthrough
CT: control target
= control target key end

     0   :  { %7 = vsyncpa [#allocation3], 0  ;;  %s259_s0 = inlined_call_operand.hbm [shape: f32[16,128], index: 0, kind: input, shape index: {}]   ;;  %s260_s1 = inlined_call_operand.hbm [shape: f32[16,128], index: 1, kind: input, shape index: {}]   ;;  %s261_s2 = inlined_call_operand.hbm [shape: f32[1,4,8,128], index: 2, kind: output, shape index: {}]  }
   0x1   :  { %8 = vsyncpa [#allocation6], 0 }
   0x2   :  { %9 = vsyncpa [#allocation4], 0  ;;  %s18_s11 = sshll.u32 %s259_s0, 4  ;;  %s221_s12 = smov [#allocation2]   ;;  %s19_s11 = int_to_ptr.hbm [resolvable:$true] %s18_s11 }
   0x3   :  { %s20_s13 = sshll.u32 %s221_s12, 4  ;;  %s35_s16 = sshll.u32 %s260_s1, 4  ;;  %s21_s13 = int_to_ptr.vmem [resolvable:$true] %s20_s13  ;;  %s36_s16 = int_to_ptr.hbm [resolvable:$true] %s35_s16 }
   0x4   :  { %s222_s17 = smov 128   ;;  %s223_s18 = smov 8  }
   0x5   :  { %26 = dma.hbm_to_vmem [thread:$0]  %s19_s11, 256, %s21_s13, [#allocation3], %s222_s17, %s222_s17, %s223_s18  }
   0x6   :  { %s224_s19 = smov [#allocation5]  }
   0x7   :  { %s37_s20 = sshll.u32 %s224_s19, 4  ;;  %s38_s20 = int_to_ptr.vmem [resolvable:$true] %s37_s20 }
   0x8   :  { %43 = dma.hbm_to_vmem [thread:$0]  %s36_s16, 256, %s38_s20, [#allocation6], %s222_s17, %s222_s17, %s223_s18  }
   0x9   :  { %215 = dma.done.wait [#allocation3], 256  }
   0xa   :  { %216 = vsyncadd [#allocation3], 4294967040 }
   0xb   :  { %217 = dma.done.wait [#allocation6], 256  }
   0xc   :  { %218 = vsyncadd [#allocation6], 4294967040  ;;  %v64_v0 = vld [vmem:[#allocation2] sm:$0xff]  ;;  %v65_v1 = vld [vmem:[#allocation2 + $0x8] sm:$0xff]  ;;  %s225_s0 = smov [#allocation7]   ;;  %s115_s23 = sshll.u32 %s261_s2, 4  ;;  %s116_s23 = int_to_ptr.hbm [resolvable:$true] %s115_s23 }
   0xd   :  { %v66_v2 = vld [vmem:[#allocation5] sm:$0xff]  ;;  %v67_v3 = vld [vmem:[#allocation5 + $0x8] sm:$0xff]  ;;  %135 = vlog2.f32 %v64_v0  ;;  %v96_v5 = vadd.f32 %v65_v1, %v64_v0  ;;  %v74_v6 = vsub.f32 1.0, %v64_v0  ;;  %v75_v9 = vsub.f32 1.0, %v65_v1  ;;  %s113_s1 = sshll.u32 %s225_s0, 4  ;;  %s114_s1 = int_to_ptr.vmem [resolvable:$true] %s113_s1 }
   0xe   :  { %v89_v4 = vmul.f32 %v66_v2, %v64_v0  ;;  %137 = vlog2.f32 %v65_v1  ;;  %v90_v7 = vmul.f32 %v67_v3, %v65_v1  ;;  %v101_v8 = vadd.f32 %v67_v3, %v66_v2 }
   0xf   :  { %139 = vlog2.f32 %v74_v6  ;;  %98 = vst [vmem:[#allocation7 + $0x8] sm:$0xff] %v96_v5 }
  0x10   :  { %v91_v10 = vadd.f32 %v90_v7, %v89_v4  ;;  %141 = vlog2.f32 %v75_v9  ;;  %103 = vst [vmem:[#allocation7 + $0x10] sm:$0xff] %v101_v8 }
  0x12   :  { %93 = vst [vmem:[#allocation7] sm:$0xff] %v91_v10 }
  0x13   :  { %v136_v11 = vpop.eup %135 }
  0x14   :  { %v138_v12 = vpop.eup %137  ;;  %v69_v13 = vmul.f32 0.6931472, %v136_v11 }
  0x15   :  { %v140_v14 = vpop.eup %139  ;;  %v71_v15 = vmul.f32 0.6931472, %v138_v12 }
  0x16   :  { %v142_v16 = vpop.eup %141  ;;  %v72_v17 = vmax.f32 %v69_v13, -100.0  ;;  %v77_v18 = vmul.f32 0.6931472, %v140_v14 }
  0x17   :  { %v73_v19 = vmax.f32 %v71_v15, -100.0  ;;  %v79_v20 = vmul.f32 0.6931472, %v142_v16 }
  0x18   :  { %v80_v21 = vmax.f32 %v77_v18, -100.0 }
  0x19   :  { %v81_v22 = vmax.f32 %v79_v20, -100.0 }
  0x1a   :  { %v82_v23 = vsub.f32 %v72_v17, %v80_v21 }
  0x1b   :  { %v83_v24 = vsub.f32 %v73_v19, %v81_v22 }
  0x1c   :  { %v84_v25 = vmul.f32 %v82_v23, %v66_v2 }
  0x1d   :  { %v85_v26 = vmul.f32 %v83_v24, %v67_v3 }
  0x1e   :  { %v86_v27 = vadd.f32 %v84_v25, %v80_v21 }
  0x1f   :  { %v87_v28 = vadd.f32 %v85_v26, %v81_v22 }
  0x21   :  { %v106_v29 = vadd.f32 %v87_v28, %v86_v27 }
  0x23   :  { %108 = vst [vmem:[#allocation7 + $0x18] sm:$0xff] %v106_v29 }
  0x24   :  { %121 = dma.vmem_to_hbm [thread:$0]  %s114_s1, 512, %s116_s23, [#allocation4], %s222_s17, %s222_s17, %s223_s18  }
  0x25   :  { %219 = dma.done.wait [#allocation4], 512  }
  0x26   :  { %220 = vsyncadd [#allocation4], 4294966784 }
  0x27   :  { %126 = vsyncpa [#allocation3], 1 }
  0x28   :  { %127 = vsyncpa [#allocation6], 1 }
  0x29   :  { %128 = vsyncpa [#allocation4], 1 }

</bundles_post_ra>
